<compile_context>
chip_gen: v7x
topology: tpu7x:2x2x1
jax: 0.10.0
libtpu: 0.0.40
codegen_flags: <defaults>
</compile_context>

<pallas_src>
import jax
import jax.numpy as jnp
import numpy as np
from jax.experimental import pallas as pl
from jax.experimental.pallas import tpu as pltpu


# ----------------------------------------------------------------------------
# Kernel
# ----------------------------------------------------------------------------
def _softplus(x):
    # Numerically stable softplus (matches F.softplus to f32 precision;
    # for x > 20 the correction term is below f32 resolution).
    return jnp.maximum(x, 0.0) + jnp.log1p(jnp.exp(-jnp.abs(x)))


def dense_block_kernel(x_ref, w_ref, b_ref, out_ref):
    # x_ref  : (TILE_N, H)            input features for this row tile
    # w_ref  : (L, D_total, H)        per-layer weights, zero-padded to D_total rows
    # b_ref  : (L, 1, H)              per-layer biases
    # out_ref: (TILE_N, D_total)      DenseNet feature buffer == final output
    H = x_ref.shape[-1]
    L = w_ref.shape[0]

    # Zero the full lane-dense tile once (future feature columns must be
    # finite, not stale VMEM, because the padded-weight scheme relies on
    # 0 * finite == 0), then drop the raw input into the first H columns.
    out_ref[...] = jnp.zeros_like(out_ref)
    out_ref[:, 0:H] = x_ref[...]

    # Static, unrolled layer loop (DenseNet growth).  Each layer is a single
    # full-width MXU matmul; layer i only "sees" its first H*(i+1) valid
    # columns because the remaining weight rows are zero.
    for i in range(L):
        acts = out_ref[...]                                   # (TILE_N, D_total)
        z = jnp.dot(acts, w_ref[i], preferred_element_type=jnp.float32) + b_ref[i]
        y = _softplus(z)                                      # (TILE_N, H)
        out_ref[:, (i + 1) * H:(i + 2) * H] = y


# ----------------------------------------------------------------------------
# Parameter packing (done ONCE at init, not per forward call)
# ----------------------------------------------------------------------------
def pack_dense_block_params(weights, biases):
    """weights[i]: (H*(i+1), H), biases[i]: (H,).
    Returns (w_packed (L, H*(L+1), H), b_packed (L, 1, H)), zero-padded."""
    L = len(weights)
    H = weights[0].shape[-1]
    d_total = H * (L + 1)
    w_packed = jnp.zeros((L, d_total, H), jnp.float32)
    for i, w in enumerate(weights):
        w_packed = w_packed.at[i, : H * (i + 1), :].set(w.astype(jnp.float32))
    b_packed = jnp.stack(
        [b.astype(jnp.float32).reshape(1, H) for b in biases], axis=0
    )  # (L, 1, H)
    return w_packed, b_packed


# ----------------------------------------------------------------------------
# Forward wrapper
# ----------------------------------------------------------------------------
def _round_up(n, m):
    return ((n + m - 1) // m) * m


def _choose_tile_n(n):
    """Row-tile size: big (up to 4096 rows ~ 1-2 MiB blocks) to amortize the
    per-grid-step overhead, >=2 grid steps whenever possible (v7x megacore),
    and a multiple of 8 (sublane constraint) unless n itself is < 8."""
    if n < 8:
        return n                      # single block equal to the full dim
    if n < 16:
        return 8
    return min(4096, _round_up(pl.cdiv(n, 2), 8))


def dense_block_forward(x, w_packed, b_packed):
    """x: (N, H) float32; packed params from pack_dense_block_params.
    Returns (N, H*(L+1)) float32, matching DenseBlock.forward."""
    N, H = x.shape
    L, d_total, _ = w_packed.shape

    tile_n = _choose_tile_n(N)
    grid = (pl.cdiv(N, tile_n),)      # ragged edge block handled by Pallas

    return pl.pallas_call(
        dense_block_kernel,
        out_shape=jax.ShapeDtypeStruct((N, d_total), jnp.float32),
        grid_spec=pltpu.PrefetchScalarGridSpec(
            num_scalar_prefetch=0,
            grid=grid,
            in_specs=[
                pl.BlockSpec((tile_n, H), lambda i: (i, 0)),          # row tile of x
                pl.BlockSpec((L, d_total, H), lambda i: (0, 0, 0)),   # all weights
                pl.BlockSpec((L, 1, H), lambda i: (0, 0, 0)),         # all biases
            ],
            out_specs=pl.BlockSpec((tile_n, d_total), lambda i: (i, 0)),
        ),
        compiler_params=pltpu.CompilerParams(
            dimension_semantics=("parallel",),      # independent row tiles
            vmem_limit_bytes=32 * 1024 * 1024,      # headroom for 4096-row tiles
        ),
    )(x.astype(jnp.float32), w_packed, b_packed)


dense_block_forward_jit = jax.jit(dense_block_forward)


# ----------------------------------------------------------------------------
# Independent pure-JAX reference (direct transcription of DenseBlock.forward,
# using jax.nn.softplus so it does not share the kernel's softplus formula).
# ----------------------------------------------------------------------------
def _reference(x, weights, biases):
    X = x.astype(jnp.float32)
    for w, b in zip(weights, biases):
        Y = jax.nn.softplus(X @ w + b)
        X = jnp.concatenate([X, Y], axis=-1)
    return X


def _init_params(key, hidden, num_layers):
    weights, biases = [], []
    for i in range(num_layers):
        key, kw, kb = jax.random.split(key, 3)
        fan_in = hidden * (i + 1)
        bound = 1.0 / np.sqrt(fan_in)
        weights.append(jax.random.uniform(kw, (fan_in, hidden), jnp.float32,
                                          -bound, bound))
        biases.append(jax.random.uniform(kb, (hidden,), jnp.float32,
                                         -bound, bound))
    return weights, biases


if __name__ == "__main__":
    key = jax.random.PRNGKey(0)
    k_x, k_x2, k_p = jax.random.split(key, 3)

    NEURONS_PER_LAYER = 32     # hidden width H
    NUM_LAYER = 3              # -> output width 32 * 4 = 128 (lane-dense)

    weights, biases = _init_params(k_p, NEURONS_PER_LAYER, NUM_LAYER)
    # Pack/pad parameters ONCE (hoisted out of the forward path).
    w_packed, b_packed = pack_dense_block_params(weights, biases)

    # Small batch (tile-aligned): exercises the multi-step "parallel" grid.
    N1 = 16
    x1 = jax.random.normal(k_x, (N1, NEURONS_PER_LAYER), jnp.float32)
    out1 = jax.block_until_ready(dense_block_forward_jit(x1, w_packed, b_packed))
    ref1 = jax.block_until_ready(_reference(x1, weights, biases))
    np.testing.assert_allclose(np.asarray(out1), np.asarray(ref1),
                               rtol=3e-5, atol=3e-5)
    assert out1.shape == (N1, NEURONS_PER_LAYER * (NUM_LAYER + 1))

    # Non-tile-aligned batch: exercises the ragged edge block (no pad/slice).
    N2 = 20
    x2 = jax.random.normal(k_x2, (N2, NEURONS_PER_LAYER), jnp.float32)
    out2 = jax.block_until_ready(dense_block_forward_jit(x2, w_packed, b_packed))
    ref2 = jax.block_until_ready(_reference(x2, weights, biases))
    np.testing.assert_allclose(np.asarray(out2), np.asarray(ref2),
                               rtol=3e-5, atol=3e-5)
    assert out2.shape == (N2, NEURONS_PER_LAYER * (NUM_LAYER + 1))

    print("KERNEL_OK")
</pallas_src>

<mosaic_0001>
module attributes {stable_mosaic.version = 11 : i64} {
  func.func @dense_block_kernel(%arg0: i32, %arg1: memref<8x32xf32, #tpu.memory_space<vmem>>, %arg2: memref<3x128x32xf32, #tpu.memory_space<vmem>>, %arg3: memref<3x1x32xf32, #tpu.memory_space<vmem>>, %arg4: memref<8x128xf32, #tpu.memory_space<vmem>>) attributes {dimension_semantics = [#tpu.dimension_semantics<parallel>], iteration_bounds = array<i64: 2>, scalar_prefetch = 0 : i64, scratch_operands = 0 : i64, tpu.core_type = #tpu.core_type<tc>, window_params = [{transform_indices = @transform_0, window_bounds = array<i64: 8, 32>}, {pipeline_mode = #tpu.pipeline_mode<synchronous>, transform_indices = @transform_1, window_bounds = array<i64: 3, 128, 32>}, {pipeline_mode = #tpu.pipeline_mode<synchronous>, transform_indices = @transform_2, window_bounds = array<i64: 3, 1, 32>}, {transform_indices = @transform_3, window_bounds = array<i64: 8, 128>}]} {
    %cst = arith.constant 0.000000e+00 : f32
    %0 = vector.broadcast %cst : f32 to vector<8x128xf32>
    %c0 = arith.constant 0 : index
    %c0_0 = arith.constant 0 : index
    %1 = vector.load %arg4[%c0, %c0_0] : memref<8x128xf32, #tpu.memory_space<vmem>>, vector<8x128xf32>
    tpu.vector_store %arg4[%c0, %c0_0], %0 {strides = array<i32>} : memref<8x128xf32, #tpu.memory_space<vmem>>, vector<8x128xf32>,
    %c0_1 = arith.constant 0 : index
    %c0_2 = arith.constant 0 : index
    %2 = vector.load %arg1[%c0_1, %c0_2] : memref<8x32xf32, #tpu.memory_space<vmem>>, vector<8x32xf32>
    %c0_3 = arith.constant 0 : index
    %c0_4 = arith.constant 0 : index
    %3 = vector.load %arg4[%c0_3, %c0_4] : memref<8x128xf32, #tpu.memory_space<vmem>>, vector<8x32xf32>
    tpu.vector_store %arg4[%c0_3, %c0_4], %2 {strides = array<i32>} : memref<8x128xf32, #tpu.memory_space<vmem>>, vector<8x32xf32>,
    %c0_5 = arith.constant 0 : index
    %c0_6 = arith.constant 0 : index
    %4 = vector.load %arg4[%c0_5, %c0_6] : memref<8x128xf32, #tpu.memory_space<vmem>>, vector<8x128xf32>
    %c0_7 = arith.constant 0 : index
    %c0_8 = arith.constant 0 : index
    %c0_9 = arith.constant 0 : index
    %5 = vector.load %arg2[%c0_7, %c0_8, %c0_9] : memref<3x128x32xf32, #tpu.memory_space<vmem>>, vector<1x128x32xf32>
    %6 = vector.shape_cast %5 : vector<1x128x32xf32> to vector<128x32xf32>
    %cst_10 = arith.constant dense<0.000000e+00> : vector<8x32xf32>
    %7 = tpu.matmul %4, %6, %cst_10 {dimension_numbers = #tpu.dot_dimension_numbers<[1], [0], [0], [1], [0, 0, 1, 1], [], []>} : vector<8x128xf32>, vector<128x32xf32>, vector<8x32xf32> -> vector<8x32xf32>
    %c0_11 = arith.constant 0 : index
    %c0_12 = arith.constant 0 : index
    %c0_13 = arith.constant 0 : index
    %8 = vector.load %arg3[%c0_11, %c0_12, %c0_13] : memref<3x1x32xf32, #tpu.memory_space<vmem>>, vector<1x1x32xf32>
    %9 = vector.shape_cast %8 : vector<1x1x32xf32> to vector<1x32xf32>
    %10 = vector.broadcast %9 : vector<1x32xf32> to vector<8x32xf32>
    %11 = arith.addf %7, %10 : vector<8x32xf32>
    %cst_14 = arith.constant 0.000000e+00 : f32
    %12 = vector.broadcast %cst_14 : f32 to vector<8x32xf32>
    %13 = arith.maximumf %11, %12 : vector<8x32xf32>
    %14 = math.absf %11 : vector<8x32xf32>
    %cst_15 = arith.constant 0.000000e+00 : f32
    %15 = vector.broadcast %cst_15 : f32 to vector<8x32xf32>
    %16 = arith.subf %15, %14 : vector<8x32xf32>
    %17 = math.exp %16 : vector<8x32xf32>
    %18 = math.log1p %17 : vector<8x32xf32>
    %19 = arith.addf %13, %18 : vector<8x32xf32>
    %c0_16 = arith.constant 0 : index
    %c32 = arith.constant 32 : index
    %20 = vector.load %arg4[%c0_16, %c32] : memref<8x128xf32, #tpu.memory_space<vmem>>, vector<8x32xf32>
    tpu.vector_store %arg4[%c0_16, %c32], %19 {strides = array<i32>} : memref<8x128xf32, #tpu.memory_space<vmem>>, vector<8x32xf32>,
    %c0_17 = arith.constant 0 : index
    %c0_18 = arith.constant 0 : index
    %21 = vector.load %arg4[%c0_17, %c0_18] : memref<8x128xf32, #tpu.memory_space<vmem>>, vector<8x128xf32>
    %c1 = arith.constant 1 : index
    %c0_19 = arith.constant 0 : index
    %c0_20 = arith.constant 0 : index
    %22 = vector.load %arg2[%c1, %c0_19, %c0_20] : memref<3x128x32xf32, #tpu.memory_space<vmem>>, vector<1x128x32xf32>
    %23 = vector.shape_cast %22 : vector<1x128x32xf32> to vector<128x32xf32>
    %cst_21 = arith.constant dense<0.000000e+00> : vector<8x32xf32>
    %24 = tpu.matmul %21, %23, %cst_21 {dimension_numbers = #tpu.dot_dimension_numbers<[1], [0], [0], [1], [0, 0, 1, 1], [], []>} : vector<8x128xf32>, vector<128x32xf32>, vector<8x32xf32> -> vector<8x32xf32>
    %c1_22 = arith.constant 1 : index
    %c0_23 = arith.constant 0 : index
    %c0_24 = arith.constant 0 : index
    %25 = vector.load %arg3[%c1_22, %c0_23, %c0_24] : memref<3x1x32xf32, #tpu.memory_space<vmem>>, vector<1x1x32xf32>
    %26 = vector.shape_cast %25 : vector<1x1x32xf32> to vector<1x32xf32>
    %27 = vector.broadcast %26 : vector<1x32xf32> to vector<8x32xf32>
    %28 = arith.addf %24, %27 : vector<8x32xf32>
    %cst_25 = arith.constant 0.000000e+00 : f32
    %29 = vector.broadcast %cst_25 : f32 to vector<8x32xf32>
    %30 = arith.maximumf %28, %29 : vector<8x32xf32>
    %31 = math.absf %28 : vector<8x32xf32>
    %cst_26 = arith.constant 0.000000e+00 : f32
    %32 = vector.broadcast %cst_26 : f32 to vector<8x32xf32>
    %33 = arith.subf %32, %31 : vector<8x32xf32>
    %34 = math.exp %33 : vector<8x32xf32>
    %35 = math.log1p %34 : vector<8x32xf32>
    %36 = arith.addf %30, %35 : vector<8x32xf32>
    %c0_27 = arith.constant 0 : index
    %c64 = arith.constant 64 : index
    %37 = vector.load %arg4[%c0_27, %c64] : memref<8x128xf32, #tpu.memory_space<vmem>>, vector<8x32xf32>
    tpu.vector_store %arg4[%c0_27, %c64], %36 {strides = array<i32>} : memref<8x128xf32, #tpu.memory_space<vmem>>, vector<8x32xf32>,
    %c0_28 = arith.constant 0 : index
    %c0_29 = arith.constant 0 : index
    %38 = vector.load %arg4[%c0_28, %c0_29] : memref<8x128xf32, #tpu.memory_space<vmem>>, vector<8x128xf32>
    %c2 = arith.constant 2 : index
    %c0_30 = arith.constant 0 : index
    %c0_31 = arith.constant 0 : index
    %39 = vector.load %arg2[%c2, %c0_30, %c0_31] : memref<3x128x32xf32, #tpu.memory_space<vmem>>, vector<1x128x32xf32>
    %40 = vector.shape_cast %39 : vector<1x128x32xf32> to vector<128x32xf32>
    %cst_32 = arith.constant dense<0.000000e+00> : vector<8x32xf32>
    %41 = tpu.matmul %38, %40, %cst_32 {dimension_numbers = #tpu.dot_dimension_numbers<[1], [0], [0], [1], [0, 0, 1, 1], [], []>} : vector<8x128xf32>, vector<128x32xf32>, vector<8x32xf32> -> vector<8x32xf32>
    %c2_33 = arith.constant 2 : index
    %c0_34 = arith.constant 0 : index
    %c0_35 = arith.constant 0 : index
    %42 = vector.load %arg3[%c2_33, %c0_34, %c0_35] : memref<3x1x32xf32, #tpu.memory_space<vmem>>, vector<1x1x32xf32>
    %43 = vector.shape_cast %42 : vector<1x1x32xf32> to vector<1x32xf32>
    %44 = vector.broadcast %43 : vector<1x32xf32> to vector<8x32xf32>
    %45 = arith.addf %41, %44 : vector<8x32xf32>
    %cst_36 = arith.constant 0.000000e+00 : f32
    %46 = vector.broadcast %cst_36 : f32 to vector<8x32xf32>
    %47 = arith.maximumf %45, %46 : vector<8x32xf32>
    %48 = math.absf %45 : vector<8x32xf32>
    %cst_37 = arith.constant 0.000000e+00 : f32
    %49 = vector.broadcast %cst_37 : f32 to vector<8x32xf32>
    %50 = arith.subf %49, %48 : vector<8x32xf32>
    %51 = math.exp %50 : vector<8x32xf32>
    %52 = math.log1p %51 : vector<8x32xf32>
    %53 = arith.addf %47, %52 : vector<8x32xf32>
    %c0_38 = arith.constant 0 : index
    %c96 = arith.constant 96 : index
    %54 = vector.load %arg4[%c0_38, %c96] : memref<8x128xf32, #tpu.memory_space<vmem>>, vector<8x32xf32>
    tpu.vector_store %arg4[%c0_38, %c96], %53 {strides = array<i32>} : memref<8x128xf32, #tpu.memory_space<vmem>>, vector<8x32xf32>,
    return
  }
  func.func @transform_0(%arg0: i32) -> (i32, i32) {
    %c0_i32 = arith.constant 0 : i32
    %c0_i32_0 = arith.constant 0 : i32
    return %arg0, %c0_i32 : i32, i32
  }
  func.func @transform_1(%arg0: i32) -> (i32, i32, i32) {
    %c0_i32 = arith.constant 0 : i32
    %c0_i32_0 = arith.constant 0 : i32
    %c0_i32_1 = arith.constant 0 : i32
    %c0_i32_2 = arith.constant 0 : i32
    return %c0_i32, %c0_i32_0, %c0_i32_1 : i32, i32, i32
  }
  func.func @transform_2(%arg0: i32) -> (i32, i32, i32) {
    %c0_i32 = arith.constant 0 : i32
    %c0_i32_0 = arith.constant 0 : i32
    %c0_i32_1 = arith.constant 0 : i32
    %c0_i32_2 = arith.constant 0 : i32
    return %c0_i32, %c0_i32_0, %c0_i32_1 : i32, i32, i32
  }
  func.func @transform_3(%arg0: i32) -> (i32, i32) {
    %c0_i32 = arith.constant 0 : i32
    %c0_i32_0 = arith.constant 0 : i32
    return %arg0, %c0_i32 : i32, i32
  }
}

</mosaic_0001>

<bundles_post_ra>
// kernel: dense_block_forward.1
= control target key start
LH: loop header
LB: loop body
LE: loop exit
PB: predicated region body
PF: predicated region fallthrough
CT: control target
= control target key end

     0   :  { %8 = vsyncpa [#allocation3], 0  ;;  %s1310_s0 = inlined_call_operand.vmem [shape: f32[16,32], index: 0, kind: input, shape index: {}]   ;;  %s1311_s1 = inlined_call_operand.vmem [shape: f32[3,128,32], index: 1, kind: input, shape index: {}]   ;;  %s1312_s2 = inlined_call_operand.vmem [shape: f32[3,1,32], index: 2, kind: input, shape index: {}]   ;;  %s1313_s3 = inlined_call_operand.hbm [shape: f32[16,128], index: 3, kind: output, shape index: {}]  }
   0x1   :  { %10 = vsyncpa [#allocation3 + $0x1], 0  ;;  %s1015_s12 = smov 0   ;;  %s1017_s13 = smov 0  }
   0x2   :  { %s1019_s14 = smov 0   ;;  %s1021_s15 = smov 0  }
   0x3 LB: > { %s1036_s16 = sadd.s32 4294967295, %s986_s15   ;;  %s592_s17 = sadd.s32 4294967294, %s986_s15   ;;  %s986_s15 = sphi %s1021_s15, %s1319_s15   ;;  %s982_s14 = sphi %s1019_s14, %s1318_s14   ;;  %s978_s13 = sphi %s1017_s13, %s1317_s13   ;;  %s974_s12 = sphi %s1015_s12, %s1316_s12  }
   0x4   : > { %s1040_s18 = sadd.s32 1, %s986_s15   ;;  %s91_s19 = sadd.s32 1, %s982_s14 }
   0x5   : > { %s88_s20 = ssub.s32 %s986_s15, %s1040_s18  ;;  %p101_p0 = scmp.ne.s32.totalorder %s982_s14, %s978_s13 }
   0x6   : > { %p89_p1 = scmp.eq.s32.totalorder %s88_s20, 0  ;;  %p102_p2 = scmp.eq.s32.totalorder %s1036_s16, 1 }
   0x7   : > { %p107_p3 = scmp.ne.s32.totalorder %s978_s13, %s974_s12  ;;  %p108_p4 = scmp.eq.s32.totalorder %s592_s17, 1 }
   0x8   : > { %s1051_s21 = scalar_select %p89_p1, %s982_s14, %s91_s19  }
   0x9   : > { %p1053_p5 = por %p102_p2, %p101_p0  ;;  %p1057_p6 = por %p108_p4, %p107_p3 }
   0xa   : > { %p595_p7 = scmp.ge.s32.totalorder %s986_s15, 1  ;;  %p139_p8 = scmp.lt.s32.totalorder %s986_s15, 3 }
   0xc   : > { %p140_p9 = pnand %p595_p7, %p139_p8 }
   0xd   : > { %v171_v0 = vld [vmem:[%s1311_s1] sm:$0xff] (!%p140_p9)  ;;  %v172_v1 = vld [vmem:[%s1311_s1 + $0x8] sm:$0xff] (!%p140_p9)  ;;  %v173_v2 = vld [vmem:[%s1311_s1 + $0x10] sm:$0xff] (!%p140_p9)  ;;  %s159_s30 = sand.u32 (!%p140_p9), 1, %s978_s13   ;;  %p162_p10 = scmp.lt.s32.totalorder (!%p140_p9), %s1036_s16, 1  ;;  %v988_v3 = vmov (!%p140_p9), 0.0|0.0  }
   0xe   : > { %143 = sbr.rel (%p140_p9) target bundleno = 1169 (0x491), region = 32  ;;  %795 = vmatprep.subr.bf16.mxu0 (!%p140_p9), %v988_v3  ;;  %v796_v4 = vpack.c.bf16 (!%p140_p9), %v172_v1, %v171_v0  ;;  %v174_v5 = vld [vmem:[%s1311_s1 + $0x18] sm:$0xff] (!%p140_p9)  ;;  %s596_s6 = sshll.u32 (!%p140_p9), %s159_s30, 3  ;;  %819 = vmatprep.subr.bf16.mxu1 (!%p140_p9), %v988_v3  ;;  %v989_v7 = vmov (!%p140_p9), 0.0   ;;  %vm990_vm0 = vmmov (!%p140_p9), 0   ;;  %v175_v8 = vld [vmem:[%s1311_s1 + $0x20] sm:$0xff] (!%p140_p9) }
   0xf   : > { %v799_v6 = vpack.c.bf16 (!%p140_p9), %v174_v5, %v173_v2  ;;  %s1082_s8 = scalar_lea.vmem (!%p140_p9), [#allocation2], %s596_s6  ;;  %722 = vmatprep.mubr.msk.f32.mxu0 (!%p140_p9), %vm990_vm0, %v989_v7  ;;  %v176_v9 = vld [vmem:[%s1311_s1 + $0x28] sm:$0xff] (!%p140_p9)  ;;  %757 = vmatprep.mubr.msk.f32.mxu1 (!%p140_p9), %vm990_vm0, %v989_v7  ;;  %vm168_vm1 = vcmask (!%p140_p9), 261120   ;;  %v177_v12 = vld [vmem:[%s1311_s1 + $0x30] sm:$0xff] (!%p140_p9)  ;;  %v178_v13 = vld [vmem:[%s1311_s1 + $0x38] sm:$0xff] (!%p140_p9)  ;;  %s991_s6 = smov (!%p140_p9), 32  }
  0x10   : > { %797 = vmatpush3.bf16.msra.mxu0 (!%p140_p9), %v796_v4  ;;  %166 = vst [vmem:[%s1082_s8] sm:$0xff] (!%p140_p9), %v989_v7  ;;  %v802_v10 = vpack.c.bf16 (!%p140_p9), %v176_v9, %v175_v8  ;;  %v805_v14 = vpack.c.bf16 (!%p140_p9), %v178_v13, %v177_v12  ;;  %v179_v15 = vld [vmem:[%s1311_s1 + $0x40] sm:$0xff] (!%p140_p9)  ;;  %v180_v16 = vld [vmem:[%s1311_s1 + $0x48] sm:$0xff] (!%p140_p9)  ;;  %v181_v18 = vld [vmem:[%s1311_s1 + $0x50] sm:$0xff] (!%p140_p9)  ;;  %vm283_vm3 = vcmask (!%p140_p9), 523520   ;;  %s992_s10 = smov (!%p140_p9), 64   ;;  %vm400_vm5 = vcmask (!%p140_p9), 785920  }
  0x11   : > { %798 = vmatprep.subr.bf16.mxu0 (!%p140_p9), %v988_v3  ;;  %v808_v17 = vpack.c.bf16 (!%p140_p9), %v180_v16, %v179_v15  ;;  %v182_v19 = vld [vmem:[%s1311_s1 + $0x58] sm:$0xff] (!%p140_p9)  ;;  %v183_v21 = vld [vmem:[%s1311_s1 + $0x60] sm:$0xff] (!%p140_p9)  ;;  %v184_v22 = vld [vmem:[%s1311_s1 + $0x68] sm:$0xff] (!%p140_p9)  ;;  %s636_s20 = sshll.u32 (!%p140_p9), %s1036_s16, 7  ;;  %s533_s24 = sshll.u32 (!%p140_p9), %s1082_s8, 4  ;;  %vm517_vm7 = vcmask (!%p140_p9), 1048320   ;;  %s1267_s24 = int_to_ptr.vmem [resolvable:$true] %s533_s24 }
  0x12   : > { %v811_v20 = vpack.c.bf16 (!%p140_p9), %v182_v19, %v181_v18  ;;  %v814_v23 = vpack.c.bf16 (!%p140_p9), %v184_v22, %v183_v21  ;;  %v185_v24 = vld [vmem:[%s1311_s1 + $0x70] sm:$0xff] (!%p140_p9)  ;;  %v186_v25 = vld [vmem:[%s1311_s1 + $0x78] sm:$0xff] (!%p140_p9)  ;;  %v599_v28 = vld [vmem:[%s1311_s1 + $0x80] sm:$0xff] (!%p140_p9)  ;;  %s1265_s27 = scalar_lea.hbm (!%p140_p9), %s1313_s3, %s636_s20  ;;  %s520_s28 = scalar_lea.sflag (!%p140_p9), [#allocation3], %s159_s30 }
  0x13   : > { %v817_v26 = vpack.c.bf16 (!%p140_p9), %v186_v25, %v185_v24  ;;  %v600_v29 = vld [vmem:[%s1311_s1 + $0x88] sm:$0xff] (!%p140_p9)  ;;  %v601_v30 = vld [vmem:[%s1311_s1 + $0x90] sm:$0xff] (!%p140_p9)  ;;  %v602_v32 = vld [vmem:[%s1311_s1 + $0x98] sm:$0xff] (!%p140_p9)  ;;  %s924_s29 = scalar_lea.vmem (!%p140_p9), %s1267_s24, 128 }
  0x14   : > { %800 = vmatpush3.bf16.msra.mxu0 (!%p140_p9), %v799_v6  ;;  %v820_v31 = vpack.c.bf16 (!%p140_p9), %v600_v29, %v599_v28  ;;  %v823_v33 = vpack.c.bf16 (!%p140_p9), %v602_v32, %v601_v30  ;;  %v603_v34 = vld [vmem:[%s1311_s1 + $0xa0] sm:$0xff] (!%p140_p9)  ;;  %v604_v35 = vld [vmem:[%s1311_s1 + $0xa8] sm:$0xff] (!%p140_p9)  ;;  %v605_v37 = vld [vmem:[%s1311_s1 + $0xb0] sm:$0xff] (!%p140_p9)  ;;  %p925_p11 = scmp.ne.s32.totalorder (!%p140_p9), %s1267_s24, %s924_s29 }
  0x15   : > { %s163_s7 = scalar_select %p162_p10, %s1036_s16, 1  ;;  %801 = vmatprep.subr.bf16.mxu0 %v988_v3  ;;  %v826_v36 = vpack.c.bf16 %v604_v35, %v603_v34  ;;  %v606_v38 = vld [vmem:[%s1311_s1 + $0xb8] sm:$0xff]  ;;  %v607_v40 = vld [vmem:[%s1311_s1 + $0xc0] sm:$0xff]  ;;  %v608_v41 = vld [vmem:[%s1311_s1 + $0xc8] sm:$0xff] }
  0x16   : > { %821 = vmatpush3.bf16.msra.mxu1 %v820_v31  ;;  %v829_v39 = vpack.c.bf16 %v606_v38, %v605_v37  ;;  %v832_v42 = vpack.c.bf16 %v608_v41, %v607_v40  ;;  %v609_v43 = vld [vmem:[%s1311_s1 + $0xd0] sm:$0xff]  ;;  %v610_v44 = vld [vmem:[%s1311_s1 + $0xd8] sm:$0xff]  ;;  %v598_v46 = vld [vmem:[%s1312_s2] ss:$0 sm:$0xff]  ;;  %p926_p12 = pnand %p925_p11, %p1053_p5  ;;  %s994_s16 = smov [#allocation2]  }
  0x17   : > { %s597_s19 = sshll.u32 %s163_s7, 3  ;;  %822 = vmatprep.subr.bf16.mxu1 %v988_v3  ;;  %v835_v45 = vpack.c.bf16 %v610_v44, %v609_v43  ;;  %v611_v55 = vld [vmem:[%s1311_s1 + $0xe0] sm:$0xff]  ;;  %v612_v56 = vld [vmem:[%s1311_s1 + $0xe8] sm:$0xff]  ;;  %v613_v59 = vld [vmem:[%s1311_s1 + $0xf0] sm:$0xff]  ;;  %s928_s4 = sshll.u32 %s994_s16, 4  ;;  %s929_s4 = int_to_ptr.vmem [resolvable:$false] %s928_s4 }
  0x18   : > { %s165_s25 = scalar_lea.vmem %s1310_s0, %s597_s19  ;;  %803 = vmatpush3.bf16.msra.mxu0 %v802_v10  ;;  %v838_v57 = vpack.c.bf16 %v612_v56, %v611_v55  ;;  %v614_v60 = vld [vmem:[%s1311_s1 + $0xf8] sm:$0xff]  ;;  %v617_v9 = vld [vmem:[%s1311_s1 + $0x100] sm:$0xff]  ;;  %v618_v10 = vld [vmem:[%s1311_s1 + $0x108] sm:$0xff]  ;;  %s993_s19 = smov 96  }
  0x19   : > { %v167_v11 = vld [vmem:[%s165_s25] sm:$0xff]  ;;  %804 = vmatprep.subr.bf16.mxu0 %v988_v3  ;;  %v841_v61 = vpack.c.bf16 %v614_v60, %v613_v59  ;;  %v844_v12 = vpack.c.bf16 %v618_v10, %v617_v9  ;;  %v620_v13 = vld [vmem:[%s1311_s1 + $0x118] sm:$0xff]  ;;  %v622_v16 = vld [vmem:[%s1311_s1 + $0x128] sm:$0xff]  ;;  %p927_p13 = pneg %p926_p12  ;;  %s930_s5 = scalar_lea.vmem %s929_s4, 256 }
  0x1a   : > { %169 = vst.msk [vmem:[%s1082_s8] sm:$0xff] %vm168_vm1, %v167_v11  ;;  %824 = vmatpush3.bf16.msra.mxu1 %v823_v33  ;;  %v619_v11 = vld [vmem:[%s1311_s1 + $0x110] sm:$0xff]  ;;  %v621_v15 = vld [vmem:[%s1311_s1 + $0x120] sm:$0xff]  ;;  %v624_v19 = vld [vmem:[%s1311_s1 + $0x138] sm:$0xff]  ;;  %p931_p0 = scmp.lt.s32.totalorder %s1267_s24, %s929_s4  ;;  %p932_p1 = scmp.lt.s32.totalorder %s930_s5, %s924_s29 }
  0x1b   : > { %825 = vmatprep.subr.bf16.mxu1 %v988_v3  ;;  %v623_v18 = vld [vmem:[%s1311_s1 + $0x130] sm:$0xff]  ;;  %v625_v21 = vld [vmem:[%s1311_s1 + $0x140] sm:$0xff]  ;;  %v626_v22 = vld [vmem:[%s1311_s1 + $0x148] sm:$0xff] }
  0x1c   : > { %806 = vmatpush3.bf16.msra.mxu0 %v805_v14  ;;  %v847_v14 = vpack.c.bf16 %v620_v13, %v619_v11  ;;  %v627_v24 = vld [vmem:[%s1311_s1 + $0x150] sm:$0xff]  ;;  %v628_v25 = vld [vmem:[%s1311_s1 + $0x158] sm:$0xff]  ;;  %v630_v37 = vld [vmem:[%s1311_s1 + $0x168] sm:$0xff]  ;;  %p933_p2 = por %p932_p1, %p931_p0 }
  0x1d   : > { %807 = vmatprep.subr.bf16.mxu0 %v988_v3  ;;  %v631_v40 = vld [vmem:[%s1311_s1 + $0x170] sm:$0xff]  ;;  %v632_v41 = vld [vmem:[%s1311_s1 + $0x178] sm:$0xff] }
  0x1e   : > { %827 = vmatpush3.bf16.msra.mxu1 %v826_v36  ;;  %v629_v36 = vld [vmem:[%s1311_s1 + $0x160] sm:$0xff]  ;;  %p934_p3 = pnand %p933_p2, %p927_p13 }
  0x1f   : > { %828 = vmatprep.subr.bf16.mxu1 %v988_v3  ;;  %v862_v38 = vpack.c.bf16 %v630_v37, %v629_v36 }
  0x20   : > { %809 = vmatpush3.bf16.msra.mxu0 %v808_v17  ;;  %v850_v17 = vpack.c.bf16 %v622_v16, %v621_v15 }
  0x21   : > { %810 = vmatprep.subr.bf16.mxu0 %v988_v3  ;;  %v170_v27 = vld [vmem:[%s1082_s8] sm:$0xff] }
  0x22   : > { %830 = vmatpush3.bf16.msra.mxu1 %v829_v39 }
  0x23   : > { %831 = vmatprep.subr.bf16.mxu1 %v988_v3 }
  0x24   : > { %812 = vmatpush3.bf16.msra.mxu0 %v811_v20  ;;  %v853_v20 = vpack.c.bf16 %v624_v19, %v623_v18 }
  0x25   : > { %813 = vmatprep.subr.bf16.mxu0 %v988_v3 }
  0x26   : > { %833 = vmatpush3.bf16.msra.mxu1 %v832_v42  ;;  %v865_v42 = vpack.c.bf16 %v632_v41, %v631_v40 }
  0x27   : > { %834 = vmatprep.subr.bf16.mxu1 %v988_v3 }
  0x28   : > { %815 = vmatpush3.bf16.msra.mxu0 %v814_v23  ;;  %v856_v23 = vpack.c.bf16 %v626_v22, %v625_v21 }
  0x29   : > { %816 = vmatprep.subr.bf16.mxu0 %v988_v3 }
  0x2a   : > { %836 = vmatpush3.bf16.msra.mxu1 %v835_v45 }
  0x2b   : > { %837 = vmatprep.subr.bf16.mxu1 %v988_v3 }
  0x2c   : > { %818 = vmatpush3.bf16.msra.mxu0 %v817_v26  ;;  %v859_v26 = vpack.c.bf16 %v628_v25, %v627_v24 }
  0x2d   : > { %843 = vmatprep.subr.bf16.mxu0 %v988_v3 }
  0x2e   : > { %839 = vmatpush3.bf16.msra.mxu1 %v838_v57 }
  0x2f   : > { %723 = vmatmul.mubr.f32.vlgmr.msra.gmra.mrb[0].mxu0 %v170_v27  ;;  %840 = vmatprep.subr.bf16.mxu1 %v988_v3  ;;  %v616_v27 = vld [vmem:[%s1312_s2 + $0x1] ss:$0 sm:$0xff] }
  0x30   : > { %792 = vmatprep.mubr.msk.f32.mxu0 %vm990_vm0, %v989_v7  ;;  %845 = vmatpush3.bf16.msra.mxu0 %v844_v12 }
  0x31   : > { %846 = vmatprep.subr.bf16.mxu0 %v988_v3 }
  0x32   : > { %842 = vmatpush3.bf16.msra.mxu1 %v841_v61 }
  0x34   : > { %848 = vmatpush3.bf16.msra.mxu0 %v847_v14 }
  0x35   : > { %849 = vmatprep.subr.bf16.mxu0 %v988_v3 }
  0x38   : > { %851 = vmatpush3.bf16.msra.mxu0 %v850_v17 }
  0x39   : > { %852 = vmatprep.subr.bf16.mxu0 %v988_v3 }
  0x3c   : > { %854 = vmatpush3.bf16.msra.mxu0 %v853_v20 }
  0x3d   : > { %855 = vmatprep.subr.bf16.mxu0 %v988_v3 }
  0x40   : > { %857 = vmatpush3.bf16.msra.mxu0 %v856_v23 }
  0x41   : > { %858 = vmatprep.subr.bf16.mxu0 %v988_v3 }
  0x44   : > { %860 = vmatpush3.bf16.msra.mxu0 %v859_v26 }
  0x45   : > { %861 = vmatprep.subr.bf16.mxu0 %v988_v3 }
  0x48   : > { %863 = vmatpush3.bf16.msra.mxu0 %v862_v38 }
  0x49   : > { %864 = vmatprep.subr.bf16.mxu0 %v988_v3  ;;  %v634_v3 = vld [vmem:[%s1312_s2 + $0x2] ss:$0 sm:$0xff] }
  0x4c   : > { %866 = vmatpush3.bf16.msra.mxu0 %v865_v42 }
 0x102   : > { %v260_v47 = vpop.f32.mrb[0].mxu0 }
 0x103   : > { %v261_v48 = vadd.f32 %v598_v46, %v260_v47  ;;  %v724_v49 = vpop.f32.mrb[1].mxu0 }
 0x105   : > { %v265_v50 = vand.u32 2147483647, %v261_v48  ;;  %v264_v4 = vmax.f32 %v261_v48, 0.0 }
 0x107   : > { %v266_v51 = vsub.f32 0.0, %v265_v50 }
 0x109   : > { %v267_v52 = vmul.f32 1.442695, %v266_v51 }
 0x10b   : > { %912 = vpow2.f32 %v267_v52 }
 0x115   : > { %v913_v53 = vpop.eup %912 }
 0x116   : > { %v269_v54 = vadd.f32 1.0, %v913_v53  ;;  %v272_v58 = vmul.f32 -0.5, %v913_v53  ;;  %v275_v63 = vand.u32 2147483647, %v913_v53 }
 0x118   : > { %914 = vlog2.f32 %v269_v54  ;;  %v273_v62 = vadd.f32 1.0, %v272_v58  ;;  %vm276_vm2 = vcmp.lt.f32.partialorder %v275_v63, 0.0004427343 }
 0x11a   : > { %v274_v2 = vmul.f32 %v913_v53, %v273_v62 }
 0x122   : > { %v915_v0 = vpop.eup %914 }
 0x123   : > { %v271_v1 = vmul.f32 0.6931472, %v915_v0 }
 0x125   : > { %v277_v5 = vsel %vm276_vm2, %v274_v2, %v271_v1 }
 0x126   : > { %v278_v6 = vadd.f32 %v277_v5, %v264_v4 }
 0x128   : > { %280 = vrot.lane.b32.xlu0 %v278_v6, %s991_s6 }
 0x19a   : > { %v281_v7 = vpop.permute.xlu0 %280 }
 0x19b   : > { %284 = vst.msk [vmem:[%s1082_s8] sm:$0xff] %vm283_vm3, %v281_v7 }
 0x1a2   : > { %v285_v8 = vld [vmem:[%s1082_s8] sm:$0xff] }
 0x1a3   : > { %758 = vmatmul.mubr.f32.vlgmr.msra.gmra.mrb[0].mxu1 %v285_v8 }
 0x276   : > { %v377_v28 = vpop.f32.mrb[0].mxu1 }
 0x277   : > { %v378_v29 = vadd.f32 %v616_v27, %v377_v28  ;;  %v759_v30 = vpop.f32.mrb[1].mxu1 }
 0x279   : > { %v382_v31 = vand.u32 2147483647, %v378_v29  ;;  %v381_v48 = vmax.f32 %v378_v29, 0.0 }
 0x27b   : > { %v383_v32 = vsub.f32 0.0, %v382_v31 }
 0x27d   : > { %v384_v33 = vmul.f32 1.442695, %v383_v32 }
 0x27f   : > { %916 = vpow2.f32 %v384_v33 }
 0x289   : > { %v917_v34 = vpop.eup %916 }
 0x28a   : > { %v386_v35 = vadd.f32 1.0, %v917_v34  ;;  %v389_v39 = vmul.f32 -0.5, %v917_v34  ;;  %v392_v44 = vand.u32 2147483647, %v917_v34 }
 0x28c   : > { %918 = vlog2.f32 %v386_v35  ;;  %v390_v43 = vadd.f32 1.0, %v389_v39  ;;  %vm393_vm4 = vcmp.lt.f32.partialorder %v392_v44, 0.0004427343 }
 0x28e   : > { %v391_v47 = vmul.f32 %v917_v34, %v390_v43 }
 0x296   : > { %v919_v45 = vpop.eup %918 }
 0x297   : > { %v388_v46 = vmul.f32 0.6931472, %v919_v45 }
 0x299   : > { %v394_v49 = vsel %vm393_vm4, %v391_v47, %v388_v46 }
 0x29a   : > { %v395_v50 = vadd.f32 %v394_v49, %v381_v48 }
 0x29c   : > { %397 = vrot.lane.b32.xlu0 %v395_v50, %s992_s10 }
 0x30e   : > { %v398_v51 = vpop.permute.xlu0 %397 }
 0x30f   : > { %401 = vst.msk [vmem:[%s1082_s8] sm:$0xff] %vm400_vm5, %v398_v51 }
 0x316   : > { %v402_v52 = vld [vmem:[%s1082_s8] sm:$0xff] }
 0x317   : > { %793 = vmatmul.mubr.f32.vlgmr.msra.gmra.mrb[2].mxu0 %v402_v52 }
 0x3ea   : > { %v494_v53 = vpop.f32.mrb[2].mxu0 }
 0x3eb   : > { %v495_v54 = vadd.f32 %v634_v3, %v494_v53  ;;  %v794_v55 = vpop.f32.mrb[3].mxu0 }
 0x3ed   : > { %v499_v56 = vand.u32 2147483647, %v495_v54  ;;  %v498_v4 = vmax.f32 %v495_v54, 0.0 }
 0x3ef   : > { %v500_v57 = vsub.f32 0.0, %v499_v56 }
 0x3f1   : > { %v501_v58 = vmul.f32 1.442695, %v500_v57 }
 0x3f3   : > { %920 = vpow2.f32 %v501_v58 }
 0x3fd   : > { %v921_v59 = vpop.eup %920 }
 0x3fe   : > { %v503_v60 = vadd.f32 1.0, %v921_v59  ;;  %v506_v61 = vmul.f32 -0.5, %v921_v59  ;;  %v509_v63 = vand.u32 2147483647, %v921_v59 }
 0x400   : > { %922 = vlog2.f32 %v503_v60  ;;  %v507_v62 = vadd.f32 1.0, %v506_v61  ;;  %vm510_vm6 = vcmp.lt.f32.partialorder %v509_v63, 0.0004427343 }
 0x402   : > { %v508_v2 = vmul.f32 %v921_v59, %v507_v62 }
 0x40a   : > { %v923_v0 = vpop.eup %922 }
 0x40b   : > { %v505_v1 = vmul.f32 0.6931472, %v923_v0 }
 0x40d   : > { %v511_v5 = vsel %vm510_vm6, %v508_v2, %v505_v1 }
 0x40e   : > { %v512_v6 = vadd.f32 %v511_v5, %v498_v4 }
 0x410   : > { %514 = vrot.lane.b32.xlu1 %v512_v6, %s993_s19 }
 0x482   : > { %v515_v7 = vpop.permute.xlu1 %514 }
 0x483   : > { %518 = vst.msk [vmem:[%s1082_s8] sm:$0xff] %vm517_vm7, %v515_v7 }
 0x484   : > { %937 = shalt.err (!%p934_p3)
}
 0x485   : > { %s938_s30 = scalar_lea.hbm %s1265_s27, 128  ;;  %s942_s7 = scalar_lea.hbm %s1313_s3, 256 }
 0x486   : > { %p939_p4 = scmp.ne.s32.totalorder %s1265_s27, %s938_s30  ;;  %p943_p9 = scmp.lt.u32.totalorder %s1265_s27, %s1313_s3 }
 0x487   : > { %p944_p10 = scmp.lt.u32.totalorder %s942_s7, %s938_s30  ;;  %p946_p12 = scmp.lt.u32.totalorder %s938_s30, %s1265_s27 }
 0x488   : > { %p940_p7 = pnand %p939_p4, %p1053_p5 }
 0x489   : > { %p945_p11 = por %p944_p10, %p943_p9 }
 0x48a   : > { %p941_p8 = pneg %p940_p7 }
 0x48b   : > { %p947_p13 = por %p946_p12, %p945_p11 }
 0x48d   : > { %p948_p0 = pnand %p947_p13, %p941_p8 }
 0x48f   : > { %951 = shalt.err (!%p948_p0)
}
 0x490   : > { %867 = dma.vmem_to_hbm [thread:$0]  (%p1053_p5), %s1267_s24, 128, %s1265_s27, %s520_s28  }
 0x491 PF: > { %p873_p1 = scmp.ge.s32.totalorder %s986_s15, 2  ;;  %s545_s11 = sand.u32 1, %s974_s12  }
 0x492   : > { %s546_s17 = scalar_lea.sflag [#allocation3], %s545_s11 }
 0x493   : > { %p870_p2 = pnand %p873_p1, %p1057_p6 }
 0x495   : > { %969 = dma.done.wait (!%p870_p2), %s546_s17, 128  }
 0x496   : > { %971 = vsyncadd (!%p870_p2), %s546_s17, 4294967168  ;;  %p13_p3 = scmp.ge.s32.totalorder %s1040_s18, 4   ;;  %s1316_s12 = smov %s978_s13 }
 0x497   : > { %s1317_s13 = smov %s982_s14  ;;  %s1318_s14 = smov %s1051_s21 }
 0x498   : > { %s1319_s15 = smov %s1040_s18  ;;  %15 = sbr.rel (!%p13_p3) target bundleno = 3 (0x3), region = 71 }
 0x49f   :  { %551 = vsyncpa [#allocation3], 1 }
 0x4a0   :  { %553 = vsyncpa [#allocation3 + $0x1], 1 }

</bundles_post_ra>
